<compile_context>
chip_gen: v7x
topology: tpu7x:2x2x1
jax: 0.10.0
libtpu: 0.0.40
codegen_flags: <defaults>
</compile_context>

<pallas_src>
import functools

import jax
import jax.numpy as jnp
from jax.experimental import pallas as pl
from jax.experimental.pallas import tpu as pltpu


def _round_up(x, m):
    return ((x + m - 1) // m) * m


def _pick_tile(n, cap, align=1):
    """Largest divisor of n that is <= cap and (multiple of `align` or == n)."""
    for d in range(min(n, cap), 0, -1):
        if n % d == 0 and (d % align == 0 or d == n):
            return d
    return n


# ---------------------------------------------------------------------------
# Kernel A: pre-multiplied gate table  = embedding @ [W_ir|W_iz|W_in] + bias
# Grid-parallel over vocab-row tiles; weights stay VMEM-resident.
# ---------------------------------------------------------------------------
def gate_table_kernel(emb_ref, wih_ref, b_ref, o_ref):
    o_ref[...] = (jnp.dot(emb_ref[...], wih_ref[...],
                          preferred_element_type=jnp.float32)
                  + b_ref[...]).astype(o_ref.dtype)


# ---------------------------------------------------------------------------
# Kernel B: GRU recurrence over a block of TT time steps per grid iteration.
# gx_ref carries the precomputed input-gate activations (T, B, 3H); per step
# there is a single fused (B,H)@(H,3H) MXU matmul.  hT_ref is the VMEM-
# resident carry (constant output block index across the "arbitrary" axis).
# ---------------------------------------------------------------------------
def gru_kernel(gx_ref, h0_ref, whh_ref, bhn_ref, hs_ref, hT_ref, *, unroll):
    tb = pl.program_id(0)

    @pl.when(tb == 0)
    def _():
        hT_ref[...] = h0_ref[...]

    TT = gx_ref.shape[0]
    H = hT_ref.shape[-1]

    whh = whh_ref[...]          # (H, 3H)  fused [r|z|n] along lanes
    b_hn = bhn_ref[...]         # (1, H)   only bias that cannot be pre-folded

    def step(tt, h):
        # gx[:, :H]   = x@W_ir + b_ir + b_hr
        # gx[:, H:2H] = x@W_iz + b_iz + b_hz
        # gx[:, 2H:]  = x@W_in + b_in
        gx = gx_ref[tt]                                           # (B, 3H)
        hg = jnp.dot(h, whh, preferred_element_type=jnp.float32)  # (B, 3H), 1 push
        r = jax.nn.sigmoid(gx[:, :H] + hg[:, :H])
        z = jax.nn.sigmoid(gx[:, H:2 * H] + hg[:, H:2 * H])
        n = jnp.tanh(gx[:, 2 * H:] + r * (hg[:, 2 * H:] + b_hn))
        h_new = (1.0 - z) * n + z * h
        hs_ref[tt] = h_new.astype(hs_ref.dtype)                   # time-major store
        return h_new

    hT_ref[...] = jax.lax.fori_loop(0, TT, step, hT_ref[...], unroll=unroll)


# ---------------------------------------------------------------------------
# Kernel C: output projection on the flattened (B*T, H) hidden states.
# bf16 MXU inputs, f32 accumulation; one dot per grid step; lane-dense store.
# ---------------------------------------------------------------------------
def proj_kernel(h_ref, w_ref, b_ref, o_ref):
    h = h_ref[...].astype(jnp.bfloat16)          # (tp, H)
    acc = jnp.dot(h, w_ref[...], preferred_element_type=jnp.float32)
    o_ref[...] = (acc + b_ref[...]).astype(o_ref.dtype)


def decoder_forward(tokens, hidden, params):
    """tokens: (B, T) int32, hidden: (1, B, H) -> (logits (B,T,V), hidden (1,B,H))."""
    B, T = tokens.shape
    embedding = params["embedding"]          # (V, E)
    w_ih = params["w_ih"]                    # (3, E, H)   gate order r, z, n
    w_hh = params["w_hh"]                    # (3, H, H)
    b_ih = params["b_ih"]                    # (3, 1, H)
    b_hh = params["b_hh"]                    # (3, 1, H)
    w_out = params["w_out"]                  # (H, V)
    b_out = params["b_out"]                  # (1, V)

    V, E = embedding.shape
    H = w_hh.shape[-1]

    # ---- one-time param prep (glue) ----------------------------------------
    w_ih_cat = jnp.concatenate([w_ih[0], w_ih[1], w_ih[2]], axis=1)   # (E, 3H)
    w_hh_cat = jnp.concatenate([w_hh[0], w_hh[1], w_hh[2]], axis=1)   # (H, 3H)
    # Pre-folded biases: r and z get b_i? + b_h?; n keeps only b_in here.
    b_gate = jnp.concatenate(
        [b_ih[0] + b_hh[0], b_ih[1] + b_hh[1], b_ih[2]], axis=1)      # (1, 3H)
    b_hn = b_hh[2]                                                    # (1, H)

    # ---- Kernel A: gate table (V rows, parallel) ----------------------------
    tvr = min(256, _round_up(V, 8))
    Vr = _round_up(V, tvr)
    emb_p = jnp.pad(embedding, ((0, Vr - V), (0, 0)))
    gate_table = pl.pallas_call(
        gate_table_kernel,
        out_shape=jax.ShapeDtypeStruct((Vr, 3 * H), jnp.float32),
        grid_spec=pltpu.PrefetchScalarGridSpec(
            num_scalar_prefetch=0,
            grid=(Vr // tvr,),
            in_specs=[
                pl.BlockSpec((tvr, E), lambda i: (i, 0)),
                pl.BlockSpec((E, 3 * H), lambda i: (0, 0)),
                pl.BlockSpec((1, 3 * H), lambda i: (0, 0)),
            ],
            out_specs=pl.BlockSpec((tvr, 3 * H), lambda i: (i, 0)),
        ),
        compiler_params=pltpu.CompilerParams(dimension_semantics=("parallel",)),
    )(emb_p, w_ih_cat, b_gate)

    # Glue: gather the precomputed input-gate rows per token, time-major.
    gx_tm = gate_table[tokens.T]             # (T, B, 3H)
    h0 = hidden[0]                           # (B, H)

    # ---- Kernel B: recurrence (time-blocked, sequential) ---------------------
    TT = _pick_tile(T, 128)                  # time steps per grid iteration
    unroll = _pick_tile(TT, 8)               # partial unroll (divisor of TT)
    hs, h_final = pl.pallas_call(
        functools.partial(gru_kernel, unroll=unroll),
        out_shape=(
            jax.ShapeDtypeStruct((T, B, H), jnp.float32),   # all hidden states
            jax.ShapeDtypeStruct((B, H), jnp.float32),      # final hidden (carry)
        ),
        grid_spec=pltpu.PrefetchScalarGridSpec(
            num_scalar_prefetch=0,
            grid=(T // TT,),
            in_specs=[
                pl.BlockSpec((TT, B, 3 * H), lambda t: (t, 0, 0)),  # gate inputs
                pl.BlockSpec((B, H), lambda t: (0, 0)),             # h0
                pl.BlockSpec((H, 3 * H), lambda t: (0, 0)),         # fused w_hh
                pl.BlockSpec((1, H), lambda t: (0, 0)),             # b_hn
            ],
            out_specs=[
                pl.BlockSpec((TT, B, H), lambda t: (t, 0, 0)),
                pl.BlockSpec((B, H), lambda t: (0, 0)),
            ],
        ),
        compiler_params=pltpu.CompilerParams(
            dimension_semantics=("arbitrary",),   # sequential recurrence
        ),
    )(gx_tm, h0, w_hh_cat, b_hn)

    # ---- Kernel C: projection on flattened rows, W_out VMEM-resident --------
    N = B * T
    tp = min(256, _round_up(N, 8))            # row tile (sublane aligned)
    Np = _round_up(N, tp)
    tv = min(512, _round_up(V, 128))          # vocab tile (lane aligned)
    Vp = _round_up(V, tv)

    hs_flat = jnp.transpose(hs, (1, 0, 2)).reshape(N, H)      # (B*T, H), tiny
    hs_flat = jnp.pad(hs_flat, ((0, Np - N), (0, 0)))
    w_out_p = jnp.pad(w_out, ((0, 0), (0, Vp - V))).astype(jnp.bfloat16)
    b_out_p = jnp.pad(b_out, ((0, 0), (0, Vp - V)))

    logits_flat = pl.pallas_call(
        proj_kernel,
        out_shape=jax.ShapeDtypeStruct((Np, Vp), jnp.float32),
        grid_spec=pltpu.PrefetchScalarGridSpec(
            num_scalar_prefetch=0,
            # vocab-tile axis OUTER (slowest) -> W/b tiles not re-streamed
            # across the inner row-tile loop; also leads megacore sharding.
            grid=(Vp // tv, Np // tp),
            in_specs=[
                pl.BlockSpec((tp, H), lambda j, i: (i, 0)),    # hidden rows
                pl.BlockSpec((H, tv), lambda j, i: (0, j)),    # w_out tile (bf16)
                pl.BlockSpec((1, tv), lambda j, i: (0, j)),    # b_out tile
            ],
            out_specs=pl.BlockSpec((tp, tv), lambda j, i: (i, j)),
        ),
        compiler_params=pltpu.CompilerParams(
            dimension_semantics=("parallel", "parallel"),
        ),
    )(hs_flat, w_out_p, b_out_p)

    logits = logits_flat[:N, :V].reshape(B, T, V)
    return logits, h_final[None]              # hidden -> (1, B, H)


# ---------------------------------------------------------------------------
# Pure-JAX reference matching torch.nn.GRU(batch_first=True) + Linear.
# ---------------------------------------------------------------------------
def reference_forward(tokens, hidden, params):
    emb = params["embedding"][tokens]          # (B, T, E)
    x_tm = jnp.transpose(emb, (1, 0, 2))       # (T, B, E)
    w_ih, w_hh = params["w_ih"], params["w_hh"]
    b_ih, b_hh = params["b_ih"], params["b_hh"]
    h = hidden[0]

    def step(h, x):
        r = jax.nn.sigmoid(x @ w_ih[0] + b_ih[0] + h @ w_hh[0] + b_hh[0])
        z = jax.nn.sigmoid(x @ w_ih[1] + b_ih[1] + h @ w_hh[1] + b_hh[1])
        n = jnp.tanh(x @ w_ih[2] + b_ih[2] + r * (h @ w_hh[2] + b_hh[2]))
        h_new = (1.0 - z) * n + z * h
        return h_new, h_new

    h_final, hs = jax.lax.scan(step, h, x_tm)                 # hs: (T, B, H)
    logits = jnp.einsum("tbh,hv->btv", hs, params["w_out"]) + params["b_out"][0]
    return logits, h_final[None]


def make_params(key, vocab_size, embed_size, hidden_size):
    # Weights stored gate-split and pre-transposed:
    #   w_ih[g] == torch gru.weight_ih_l0[g*H:(g+1)*H].T   (gate order r, z, n)
    #   w_hh[g] == torch gru.weight_hh_l0[g*H:(g+1)*H].T
    #   w_out   == torch linear.weight.T
    ks = jax.random.split(key, 7)
    s = 0.1
    return {
        "embedding": s * jax.random.normal(ks[0], (vocab_size, embed_size), jnp.float32),
        "w_ih": s * jax.random.normal(ks[1], (3, embed_size, hidden_size), jnp.float32),
        "w_hh": s * jax.random.normal(ks[2], (3, hidden_size, hidden_size), jnp.float32),
        "b_ih": s * jax.random.normal(ks[3], (3, 1, hidden_size), jnp.float32),
        "b_hh": s * jax.random.normal(ks[4], (3, 1, hidden_size), jnp.float32),
        "w_out": s * jax.random.normal(ks[5], (hidden_size, vocab_size), jnp.float32),
        "b_out": s * jax.random.normal(ks[6], (1, vocab_size), jnp.float32),
    }


if __name__ == "__main__":
    vocab_size, embed_size, hidden_size = 16, 32, 32
    B, T = 2, 8

    key = jax.random.PRNGKey(0)
    kp, kt, kh = jax.random.split(key, 3)

    params = make_params(kp, vocab_size, embed_size, hidden_size)
    tokens = jax.random.randint(kt, (B, T), 0, vocab_size, dtype=jnp.int32)
    hidden = jax.random.normal(kh, (1, B, hidden_size), jnp.float32)

    logits, h_out = decoder_forward(tokens, hidden, params)
    jax.block_until_ready((logits, h_out))

    ref_logits, ref_h = reference_forward(tokens, hidden, params)
    assert logits.shape == (B, T, vocab_size)
    assert h_out.shape == (1, B, hidden_size)
    # Hidden state: f32 recurrence -> tight check.
    assert jnp.allclose(h_out, ref_h, atol=2e-4, rtol=1e-4), \
        float(jnp.max(jnp.abs(h_out - ref_h)))
    # Logits: bf16-input MXU projection (f32 accumulation) -> bf16-level tolerance.
    assert jnp.allclose(logits, ref_logits, atol=2e-2, rtol=2e-2), \
        float(jnp.max(jnp.abs(logits - ref_logits)))

    # TODO(synk): module's log_softmax / linear_hidden(init_hidden) are not part
    # of forward(); not implemented here.
    print("KERNEL_OK")
</pallas_src>

<mosaic_0001>
module attributes {stable_mosaic.version = 11 : i64} {
  func.func @gate_table_kernel(%arg0: i32, %arg1: memref<16x32xf32, #tpu.memory_space<vmem>>, %arg2: memref<32x96xf32, #tpu.memory_space<vmem>>, %arg3: memref<1x96xf32, #tpu.memory_space<vmem>>, %arg4: memref<16x96xf32, #tpu.memory_space<vmem>>) attributes {dimension_semantics = [#tpu.dimension_semantics<parallel>], iteration_bounds = array<i64: 1>, scalar_prefetch = 0 : i64, scratch_operands = 0 : i64, tpu.core_type = #tpu.core_type<tc>, window_params = [{transform_indices = @transform_0, window_bounds = array<i64: 16, 32>}, {pipeline_mode = #tpu.pipeline_mode<synchronous>, transform_indices = @transform_1, window_bounds = array<i64: 32, 96>}, {pipeline_mode = #tpu.pipeline_mode<synchronous>, transform_indices = @transform_2, window_bounds = array<i64: 1, 96>}, {transform_indices = @transform_3, window_bounds = array<i64: 16, 96>}]} {
    %c0 = arith.constant 0 : index
    %c0_0 = arith.constant 0 : index
    %0 = vector.load %arg1[%c0, %c0_0] : memref<16x32xf32, #tpu.memory_space<vmem>>, vector<16x32xf32>
    %c0_1 = arith.constant 0 : index
    %c0_2 = arith.constant 0 : index
    %1 = vector.load %arg2[%c0_1, %c0_2] : memref<32x96xf32, #tpu.memory_space<vmem>>, vector<32x96xf32>
    %cst = arith.constant dense<0.000000e+00> : vector<16x96xf32>
    %2 = tpu.matmul %0, %1, %cst {dimension_numbers = #tpu.dot_dimension_numbers<[1], [0], [0], [1], [0, 0, 1, 1], [], []>} : vector<16x32xf32>, vector<32x96xf32>, vector<16x96xf32> -> vector<16x96xf32>
    %c0_3 = arith.constant 0 : index
    %c0_4 = arith.constant 0 : index
    %3 = vector.load %arg3[%c0_3, %c0_4] : memref<1x96xf32, #tpu.memory_space<vmem>>, vector<1x96xf32>
    %4 = vector.broadcast %3 : vector<1x96xf32> to vector<16x96xf32>
    %5 = arith.addf %2, %4 : vector<16x96xf32>
    %c0_5 = arith.constant 0 : index
    %c0_6 = arith.constant 0 : index
    %6 = vector.load %arg4[%c0_5, %c0_6] : memref<16x96xf32, #tpu.memory_space<vmem>>, vector<16x96xf32>
    tpu.vector_store %arg4[%c0_5, %c0_6], %5 {strides = array<i32>} : memref<16x96xf32, #tpu.memory_space<vmem>>, vector<16x96xf32>,
    return
  }
  func.func @transform_0(%arg0: i32) -> (i32, i32) {
    %c0_i32 = arith.constant 0 : i32
    %c0_i32_0 = arith.constant 0 : i32
    return %arg0, %c0_i32 : i32, i32
  }
  func.func @transform_1(%arg0: i32) -> (i32, i32) {
    %c0_i32 = arith.constant 0 : i32
    %c0_i32_0 = arith.constant 0 : i32
    %c0_i32_1 = arith.constant 0 : i32
    return %c0_i32, %c0_i32_0 : i32, i32
  }
  func.func @transform_2(%arg0: i32) -> (i32, i32) {
    %c0_i32 = arith.constant 0 : i32
    %c0_i32_0 = arith.constant 0 : i32
    %c0_i32_1 = arith.constant 0 : i32
    return %c0_i32, %c0_i32_0 : i32, i32
  }
  func.func @transform_3(%arg0: i32) -> (i32, i32) {
    %c0_i32 = arith.constant 0 : i32
    %c0_i32_0 = arith.constant 0 : i32
    return %arg0, %c0_i32 : i32, i32
  }
}

</mosaic_0001>

<bundles_post_ra>
// kernel: tpu_custom_call.1
= control target key start
LH: loop header
LB: loop body
LE: loop exit
PB: predicated region body
PF: predicated region fallthrough
CT: control target
= control target key end

     0   :  { %8 = vsyncpa [#allocation3], 0  ;;  %s337_s0 = inlined_call_operand.hbm [shape: f32[16,32], index: 0, kind: input, shape index: {}]   ;;  %s338_s1 = inlined_call_operand.hbm [shape: f32[32,96], index: 1, kind: input, shape index: {}]   ;;  %s339_s2 = inlined_call_operand.vmem [shape: f32[1,96], index: 2, kind: input, shape index: {}]   ;;  %s340_s3 = inlined_call_operand.hbm [shape: f32[16,96], index: 3, kind: output, shape index: {}]  }
   0x1   :  { %9 = vsyncpa [#allocation6], 0 }
   0x2   :  { %10 = vsyncpa [#allocation4], 0  ;;  %s264_s12 = smov [#allocation2]   ;;  %s192_s16 = scalar_lea.hbm %s337_s0, 256 }
   0x3   :  { %s16_s13 = sshll.u32 %s264_s12, 4  ;;  %p193_p0 = scmp.ne.s32.totalorder %s337_s0, %s192_s16  ;;  %s17_s13 = int_to_ptr.vmem [resolvable:$true] %s16_s13 }
   0x4   :  { %p196_p1 = scmp.lt.u32.totalorder %s192_s16, %s337_s0 }
   0x6   :  { %p198_p2 = pnand %p196_p1, %p193_p0 }
   0x8   :  { %201 = shalt.err (!%p198_p2)
}
   0x9   :  { %s202_s21 = scalar_lea.vmem %s17_s13, 256  ;;  %p207_p4 = scmp.lt.s32.totalorder %s17_s13, %s17_s13 }
   0xa   :  { %p203_p3 = scmp.ne.s32.totalorder %s17_s13, %s202_s21  ;;  %p208_p5 = scmp.lt.s32.totalorder %s202_s21, %s202_s21 }
   0xc   :  { %p209_p6 = por %p208_p5, %p207_p4 }
   0xe   :  { %p210_p7 = pnand %p209_p6, %p203_p3 }
  0x10   :  { %213 = shalt.err (!%p210_p7)
}
  0x11   :  { %s265_s22 = smov 128   ;;  %s266_s23 = smov 8  }
  0x12   :  { %22 = dma.hbm_to_vmem [thread:$0]  %s337_s0, 256, %s17_s13, [#allocation3], %s265_s22, %s265_s22, %s266_s23  }
  0x13   :  { %s267_s26 = smov [#allocation5]   ;;  %s214_s30 = scalar_lea.hbm %s338_s1, 512 }
  0x14   :  { %s28_s27 = sshll.u32 %s267_s26, 4  ;;  %p215_p8 = scmp.ne.s32.totalorder %s338_s1, %s214_s30  ;;  %s29_s27 = int_to_ptr.vmem [resolvable:$true] %s28_s27 }
  0x15   :  { %p218_p9 = scmp.lt.u32.totalorder %s214_s30, %s338_s1 }
  0x17   :  { %p220_p10 = pnand %p218_p9, %p215_p8 }
  0x19   :  { %223 = shalt.err (!%p220_p10)
}
  0x1a   :  { %s224_s8 = scalar_lea.vmem %s29_s27, 512  ;;  %p229_p12 = scmp.lt.s32.totalorder %s29_s27, %s29_s27 }
  0x1b   :  { %p225_p11 = scmp.ne.s32.totalorder %s29_s27, %s224_s8  ;;  %p230_p13 = scmp.lt.s32.totalorder %s224_s8, %s224_s8 }
  0x1d   :  { %p231_p0 = por %p230_p13, %p229_p12 }
  0x1f   :  { %p232_p1 = pnand %p231_p0, %p225_p11 }
  0x21   :  { %235 = shalt.err (!%p232_p1)
}
  0x22   :  { %34 = dma.hbm_to_vmem [thread:$0]  %s338_s1, 512, %s29_s27, [#allocation6], %s265_s22, %s265_s22, %s266_s23  }
  0x23   :  { %258 = dma.done.wait [#allocation3], 256  }
  0x24   :  { %259 = vsyncadd [#allocation3], 4294967040 }
  0x25   :  { %260 = dma.done.wait [#allocation6], 512  }
  0x26   :  { %261 = vsyncadd [#allocation6], 4294966784  ;;  %vm56_vm0 = vcmask 261120   ;;  %v45_v0 = vld [vmem:[#allocation5] sm:$0xff]  ;;  %v46_v1 = vld [vmem:[#allocation5 + $0x8] sm:$0xff]  ;;  %s268_s11 = smov [#allocation7]  }
  0x27   :  { %v47_v2 = vld [vmem:[#allocation5 + $0x10] sm:$0xff]  ;;  %v179_v3 = vpack.c.bf16 %v46_v1, %v45_v0  ;;  %v48_v4 = vld [vmem:[#allocation5 + $0x18] sm:$0xff]  ;;  %s146_s12 = sshll.u32 %s268_s11, 4  ;;  %vm138_vm1 = vcmask 785408   ;;  %s147_s12 = int_to_ptr.vmem [resolvable:$true] %s146_s12 }
  0x28   :  { %v43_v5 = vld [vmem:[#allocation2] sm:$0xff]  ;;  %v183_v6 = vpack.c.bf16 %v48_v4, %v47_v2  ;;  %v44_v7 = vld [vmem:[#allocation2 + $0x8] sm:$0xff]  ;;  %s236_s13 = scalar_lea.vmem %s147_s12, 256  ;;  %p241_p3 = scmp.lt.s32.totalorder %s147_s12, %s147_s12 }
  0x29   :  { %176 = vmatprep.mubr.msk.f32.mxu0 %vm56_vm0, %v43_v5  ;;  %180 = vmatprep.subr.bf16.mxu0 %v179_v3  ;;  %v159_v8 = vld [vmem:[%s339_s2] ss:$0 sm:$0xff]  ;;  %p237_p2 = scmp.ne.s32.totalorder %s147_s12, %s236_s13  ;;  %p242_p4 = scmp.lt.s32.totalorder %s236_s13, %s236_s13 }
  0x2a   :  { %182 = vmatpush3.bf16.msra.mxu0 %v179_v3 }
  0x2b   :  { %184 = vmatprep.subr.bf16.mxu0 %v183_v6  ;;  %p243_p5 = por %p242_p4, %p241_p3 }
  0x2d   :  { %p244_p6 = pnand %p243_p5, %p237_p2 }
  0x2e   :  { %186 = vmatpush3.bf16.msra.mxu0 %v183_v6 }
  0x31   :  { %177 = vmatmul.mubr.msk.f32.vlgmr.msra.gmra.mrb[0].mxu0 %vm56_vm0, %v44_v7 }
 0x104   :  { %v178_v9 = vpop.f32.mrb[0].mxu0 }
 0x105   :  { %v135_v10 = vadd.f32 %v178_v9, %v159_v8  ;;  %v129_v11 = vpop.f32.mrb[1].mxu0 }
 0x106   :  { %v130_v12 = vadd.f32 %v159_v8, %v129_v11 }
 0x107   :  { %140 = vst.msk [vmem:[#allocation7 + $0x8] sm:$0xff] %vm138_vm1, %v135_v10 }
 0x108   :  { %139 = vst.msk [vmem:[#allocation7] sm:$0xff] %vm138_vm1, %v130_v12 }
 0x109   :  { %247 = shalt.err (!%p244_p6)
}
 0x10a   :  { %s248_s2 = scalar_lea.hbm %s340_s3, 256 }
 0x10b   :  { %p249_p7 = scmp.ne.s32.totalorder %s340_s3, %s248_s2  ;;  %p252_p8 = scmp.lt.u32.totalorder %s248_s2, %s340_s3 }
 0x10d   :  { %p254_p9 = pnand %p252_p8, %p249_p7 }
 0x10f   :  { %257 = shalt.err (!%p254_p9)
}
 0x110   :  { %152 = dma.vmem_to_hbm [thread:$0]  %s147_s12, 256, %s340_s3, [#allocation4], %s265_s22, %s265_s22, %s266_s23  }
 0x111   :  { %262 = dma.done.wait [#allocation4], 256  }
 0x112   :  { %263 = vsyncadd [#allocation4], 4294967040 }
 0x113   :  { %156 = vsyncpa [#allocation3], 1 }
 0x114   :  { %157 = vsyncpa [#allocation6], 1 }
 0x115   :  { %158 = vsyncpa [#allocation4], 1 }

</bundles_post_ra>
